<compile_context>
chip_gen: v7x
topology: tpu7x:2x2x1
jax: 0.10.0
libtpu: 0.0.40
codegen_flags: <defaults>
</compile_context>

<pallas_src>
import functools

import jax
import jax.numpy as jnp
from jax import lax
from jax.experimental import pallas as pl
from jax.experimental.pallas import tpu as pltpu

LANE = 128
SUB = 8
ACC_R = 32  # accumulator rows (4 vregs -> 4 independent VALU add chains)


def _chip_config():
    """Pick tile size / core split from the local chip generation."""
    try:
        kind = jax.devices()[0].device_kind.lower()
    except Exception:  # pragma: no cover - defensive
        kind = ""
    if "v7" in kind:
        # 8 MiB f32 input blocks; 2 TensorCores per chip.
        return {"tile_rows": 16384, "num_cores": 2}
    if "v6" in kind:
        # 4 MiB blocks, single TC.
        return {"tile_rows": 8192, "num_cores": 1}
    # v5e / unknown: conservative 2 MiB blocks, single TC.
    return {"tile_rows": 4096, "num_cores": 1}


def _loot_partial_kernel(p_ref, t_ref, o_ref, *, rows, tile_r, bpc, two_d):
    if two_d:
        i = pl.program_id(1)                 # row-block within this core (reduction)
        g = pl.program_id(0) * bpc + i       # global row-block index (may overrun; masked)
    else:
        i = pl.program_id(0)
        g = i

    @pl.when(i == 0)
    def _():
        o_ref[...] = jnp.zeros_like(o_ref)   # output-resident accumulator init

    d = jnp.abs(t_ref[...].astype(jnp.float32) - p_ref[...].astype(jnp.float32))

    acc_r = o_ref.shape[0]
    if tile_r % acc_r == 0:
        # Fold (tile_r,128) -> (acc_r,128) with pure elementwise vreg adds (VALU only);
        # acc_r=32 gives 4 independent add chains per lane.
        def fold(x):
            o_ref[...] += x.reshape(tile_r // acc_r, acc_r, LANE).sum(axis=0)
    else:
        # Tiny-input fallback (rows < 8): block equals the full row extent.
        def fold(x):
            o_ref[0:1, :] += x.sum(axis=0, keepdims=True)

    @pl.when((g + 1) * tile_r <= rows)       # full block: no masking cost
    def _():
        fold(d)

    @pl.when((g + 1) * tile_r > rows)        # tail / fully-out-of-range block: mask rows
    def _():
        row = g * tile_r + lax.broadcasted_iota(jnp.int32, d.shape, 0)
        fold(jnp.where(row < rows, d, 0.0))  # select (not mul) -> NaN/Inf garbage safe


def loot_loss(preds, target, z_constraints_min, z_constraints_max,
              *, tile_rows=None, num_cores=None):
    assert preds.shape == target.shape
    n = preds.size
    scale = abs(float(z_constraints_max) - float(z_constraints_min)) * 0.5

    cfg = _chip_config()
    if tile_rows is None:
        tile_rows = cfg["tile_rows"]
    if num_cores is None:
        num_cores = cfg["num_cores"]

    # Keep native dtype (no wrapper upcast); cast to f32 inside the kernel after load.
    p_flat = jnp.ravel(preds)
    t_flat = jnp.ravel(target)

    rows = n // LANE
    rem = n - rows * LANE

    total = jnp.float32(0.0)
    if rem:
        # <128-element tail: negligible, handled in plain JAX (avoids padding both
        # full arrays with an HBM->HBM concatenate).
        pt = p_flat[rows * LANE:].astype(jnp.float32)
        tt = t_flat[rows * LANE:].astype(jnp.float32)
        total = total + jnp.sum(jnp.abs(tt - pt))

    if rows > 0:
        p2 = p_flat[: rows * LANE].reshape(rows, LANE)
        t2 = t_flat[: rows * LANE].reshape(rows, LANE)

        tile_r = min(tile_rows, rows)
        if tile_r >= ACC_R:
            tile_r -= tile_r % ACC_R         # keep (32,128)-foldable blocks
        elif tile_r >= SUB:
            tile_r -= tile_r % SUB           # keep (8,128) alignment for small inputs

        acc_r = ACC_R if tile_r % ACC_R == 0 else SUB

        nb = pl.cdiv(rows, tile_r)           # total row blocks (tail masked in kernel)
        nc = num_cores if nb >= num_cores else 1
        bpc = pl.cdiv(nb, nc)                # row blocks per core

        # Explicit scoped-VMEM budget: 2 inputs x 2 buffers x tile + headroom, so the
        # per-generation default (16/32 MiB) never caps the tile sweep.
        itemsize = jnp.dtype(preds.dtype).itemsize
        vmem_limit = int(2 * 2 * tile_r * LANE * itemsize + (8 << 20))

        kernel = functools.partial(
            _loot_partial_kernel, rows=rows, tile_r=tile_r, bpc=bpc, two_d=(nc > 1))

        if nc > 1:
            # v7x: real per-TensorCore split of the streaming reduction.
            grid = (nc, bpc)
            # Clamp so an over-covering core never requests a block index past the
            # array; its contribution is fully masked inside the kernel.
            in_map = lambda c, i: (jnp.minimum(c * bpc + i, nb - 1), 0)
            out_map = lambda c, i: (c, 0)
            dims = (getattr(pltpu, "CORE_PARALLEL", "parallel"),
                    getattr(pltpu, "ARBITRARY", "arbitrary"))
        else:
            # Single-TC chips: no synthetic core axis, no clamped duplicate DMA.
            grid = (nb,)
            in_map = lambda i: (i, 0)
            out_map = lambda i: (0, 0)
            dims = ("arbitrary",)

        partials = pl.pallas_call(
            kernel,
            out_shape=jax.ShapeDtypeStruct((nc * acc_r, LANE), jnp.float32),
            grid=grid,
            in_specs=[
                pl.BlockSpec((tile_r, LANE), in_map),
                pl.BlockSpec((tile_r, LANE), in_map),
            ],
            out_specs=pl.BlockSpec((acc_r, LANE), out_map),
            compiler_params=pltpu.CompilerParams(
                dimension_semantics=dims,
                vmem_limit_bytes=vmem_limit,
            ),
        )(p2, t2)
        total = total + jnp.sum(partials)

    return (total * scale / n).astype(jnp.float32)


if __name__ == "__main__":
    # Deterministic "constraints" (module __init__ args) set in-script.
    z_constraints_min = -55.0
    z_constraints_max = 55.0

    def denorm(c):
        return (c + 1.0) * (z_constraints_max - z_constraints_min) / 2.0 + z_constraints_min

    key = jax.random.PRNGKey(0)
    kp, kt = jax.random.split(key)
    shape = (2, 4, 16, 16)
    preds = jax.random.uniform(kp, shape, jnp.float32, minval=-1.0, maxval=1.0)
    target = jax.random.uniform(kt, shape, jnp.float32, minval=-1.0, maxval=1.0)

    loss = jax.block_until_ready(loot_loss(preds, target, z_constraints_min, z_constraints_max))

    ref = jnp.mean(jnp.abs(denorm(target) - denorm(preds))).astype(jnp.float32)
    assert jnp.allclose(loss, ref, rtol=1e-5, atol=1e-5), (loss, ref)

    # Extra small-shape checks exercising the ragged-tail mask, the multi-block path,
    # and the pure-JAX remainder path.
    for idx, (shp, tr) in enumerate([((5, 300), None), ((19, 128), 8), ((3, 5, 7), None)]):
        k1, k2 = jax.random.split(jax.random.PRNGKey(idx + 1))
        p = jax.random.uniform(k1, shp, jnp.float32, minval=-1.0, maxval=1.0)
        t = jax.random.uniform(k2, shp, jnp.float32, minval=-1.0, maxval=1.0)
        got = jax.block_until_ready(
            loot_loss(p, t, z_constraints_min, z_constraints_max, tile_rows=tr))
        want = jnp.mean(jnp.abs(denorm(t) - denorm(p))).astype(jnp.float32)
        assert jnp.allclose(got, want, rtol=1e-5, atol=1e-5), (shp, got, want)

    print("KERNEL_OK")
</pallas_src>

<mosaic_0001>
module attributes {stable_mosaic.version = 11 : i64} {
  func.func @_loot_partial_kernel(%arg0: i32, %arg1: memref<16x128xf32, #tpu.memory_space<vmem>>, %arg2: memref<16x128xf32, #tpu.memory_space<vmem>>, %arg3: memref<8x128xf32, #tpu.memory_space<vmem>>) attributes {dimension_semantics = [#tpu.dimension_semantics<arbitrary>], iteration_bounds = array<i64: 1>, scalar_prefetch = 0 : i64, scratch_operands = 0 : i64, tpu.core_type = #tpu.core_type<tc>, window_params = [{transform_indices = @transform_0, window_bounds = array<i64: 16, 128>}, {transform_indices = @transform_1, window_bounds = array<i64: 16, 128>}, {pipeline_mode = #tpu.pipeline_mode<synchronous>, transform_indices = @transform_2, window_bounds = array<i64: 8, 128>}]} {
    %c0_i32 = arith.constant 0 : i32
    %0 = arith.cmpi eq, %arg0, %c0_i32 : i32
    %1 = arith.extui %0 : i1 to i32
    %c0_i32_0 = arith.constant 0 : i32
    %2 = arith.cmpi ne, %1, %c0_i32_0 : i32
    scf.if %2 {
      %cst = arith.constant 0.000000e+00 : f32
      %17 = vector.broadcast %cst : f32 to vector<8x128xf32>
      %c0_10 = arith.constant 0 : index
      %c0_11 = arith.constant 0 : index
      %18 = vector.load %arg3[%c0_10, %c0_11] : memref<8x128xf32, #tpu.memory_space<vmem>>, vector<8x128xf32>
      tpu.vector_store %arg3[%c0_10, %c0_11], %17 {strides = array<i32>} : memref<8x128xf32, #tpu.memory_space<vmem>>, vector<8x128xf32>,
    } else {
    }
    %c0 = arith.constant 0 : index
    %c0_1 = arith.constant 0 : index
    %3 = vector.load %arg2[%c0, %c0_1] : memref<16x128xf32, #tpu.memory_space<vmem>>, vector<16x128xf32>
    %c0_2 = arith.constant 0 : index
    %c0_3 = arith.constant 0 : index
    %4 = vector.load %arg1[%c0_2, %c0_3] : memref<16x128xf32, #tpu.memory_space<vmem>>, vector<16x128xf32>
    %5 = arith.subf %3, %4 : vector<16x128xf32>
    %6 = math.absf %5 : vector<16x128xf32>
    %c1_i32 = arith.constant 1 : i32
    %7 = arith.addi %arg0, %c1_i32 : i32
    %c16_i32 = arith.constant 16 : i32
    %8 = arith.muli %7, %c16_i32 : i32
    %c16_i32_4 = arith.constant 16 : i32
    %9 = arith.cmpi sle, %8, %c16_i32_4 : i32
    %10 = arith.extui %9 : i1 to i32
    %c0_i32_5 = arith.constant 0 : i32
    %11 = arith.cmpi ne, %10, %c0_i32_5 : i32
    scf.if %11 {
      %c0_10 = arith.constant 0 : index
      %c0_11 = arith.constant 0 : index
      %17 = vector.load %arg3[%c0_10, %c0_11] : memref<8x128xf32, #tpu.memory_space<vmem>>, vector<8x128xf32>
      %18 = vector.shape_cast %6 : vector<16x128xf32> to vector<2x8x128xf32>
      %cst = arith.constant dense<0.000000e+00> : vector<8x128xf32>
      %19 = vector.multi_reduction <add>, %18, %cst [0] : vector<2x8x128xf32> to vector<8x128xf32>
      %20 = arith.addf %17, %19 : vector<8x128xf32>
      %c0_12 = arith.constant 0 : index
      %c0_13 = arith.constant 0 : index
      %21 = vector.load %arg3[%c0_12, %c0_13] : memref<8x128xf32, #tpu.memory_space<vmem>>, vector<8x128xf32>
      tpu.vector_store %arg3[%c0_12, %c0_13], %20 {strides = array<i32>} : memref<8x128xf32, #tpu.memory_space<vmem>>, vector<8x128xf32>,
    } else {
    }
    %c1_i32_6 = arith.constant 1 : i32
    %12 = arith.addi %arg0, %c1_i32_6 : i32
    %c16_i32_7 = arith.constant 16 : i32
    %13 = arith.muli %12, %c16_i32_7 : i32
    %c16_i32_8 = arith.constant 16 : i32
    %14 = arith.cmpi sgt, %13, %c16_i32_8 : i32
    %15 = arith.extui %14 : i1 to i32
    %c0_i32_9 = arith.constant 0 : i32
    %16 = arith.cmpi ne, %15, %c0_i32_9 : i32
    scf.if %16 {
      %c16_i32_10 = arith.constant 16 : i32
      %17 = arith.muli %arg0, %c16_i32_10 : i32
      %18 = tpu.iota {dimensions = array<i32: 0>} : vector<16x128xi32>
      %19 = vector.broadcast %17 : i32 to vector<16x128xi32>
      %20 = arith.addi %19, %18 : vector<16x128xi32>
      %c16_i32_11 = arith.constant 16 : i32
      %21 = vector.broadcast %c16_i32_11 : i32 to vector<16x128xi32>
      %22 = arith.cmpi slt, %20, %21 : vector<16x128xi32>
      %cst = arith.constant 0.000000e+00 : f32
      %23 = vector.broadcast %cst : f32 to vector<16x128xf32>
      %24 = arith.select %22, %6, %23 : vector<16x128xi1>, vector<16x128xf32>
      %c0_12 = arith.constant 0 : index
      %c0_13 = arith.constant 0 : index
      %25 = vector.load %arg3[%c0_12, %c0_13] : memref<8x128xf32, #tpu.memory_space<vmem>>, vector<8x128xf32>
      %26 = vector.shape_cast %24 : vector<16x128xf32> to vector<2x8x128xf32>
      %cst_14 = arith.constant dense<0.000000e+00> : vector<8x128xf32>
      %27 = vector.multi_reduction <add>, %26, %cst_14 [0] : vector<2x8x128xf32> to vector<8x128xf32>
      %28 = arith.addf %25, %27 : vector<8x128xf32>
      %c0_15 = arith.constant 0 : index
      %c0_16 = arith.constant 0 : index
      %29 = vector.load %arg3[%c0_15, %c0_16] : memref<8x128xf32, #tpu.memory_space<vmem>>, vector<8x128xf32>
      tpu.vector_store %arg3[%c0_15, %c0_16], %28 {strides = array<i32>} : memref<8x128xf32, #tpu.memory_space<vmem>>, vector<8x128xf32>,
    } else {
    }
    return
  }
  func.func @transform_0(%arg0: i32) -> (i32, i32) {
    %c0_i32 = arith.constant 0 : i32
    %c0_i32_0 = arith.constant 0 : i32
    return %arg0, %c0_i32 : i32, i32
  }
  func.func @transform_1(%arg0: i32) -> (i32, i32) {
    %c0_i32 = arith.constant 0 : i32
    %c0_i32_0 = arith.constant 0 : i32
    return %arg0, %c0_i32 : i32, i32
  }
  func.func @transform_2(%arg0: i32) -> (i32, i32) {
    %c0_i32 = arith.constant 0 : i32
    %c0_i32_0 = arith.constant 0 : i32
    %c0_i32_1 = arith.constant 0 : i32
    return %c0_i32, %c0_i32_0 : i32, i32
  }
}

</mosaic_0001>

<bundles_post_ra>
// kernel: tpu_custom_call.1
= control target key start
LH: loop header
LB: loop body
LE: loop exit
PB: predicated region body
PF: predicated region fallthrough
CT: control target
= control target key end

     0   :  { %7 = vsyncpa [#allocation3], 0  ;;  %s232_s0 = inlined_call_operand.hbm [shape: f32[16,128], index: 0, kind: input, shape index: {}]   ;;  %s233_s1 = inlined_call_operand.hbm [shape: f32[16,128], index: 1, kind: input, shape index: {}]   ;;  %s234_s2 = inlined_call_operand.hbm [shape: f32[8,128], index: 2, kind: output, shape index: {}]  }
   0x1   :  { %8 = vsyncpa [#allocation6], 0 }
   0x2   :  { %9 = vsyncpa [#allocation4], 0  ;;  %s176_s9 = smov [#allocation2]   ;;  %s104_s13 = scalar_lea.hbm %s232_s0, 256 }
   0x3   :  { %s15_s10 = sshll.u32 %s176_s9, 4  ;;  %p105_p0 = scmp.ne.s32.totalorder %s232_s0, %s104_s13  ;;  %s16_s10 = int_to_ptr.vmem [resolvable:$true] %s15_s10 }
   0x4   :  { %p108_p1 = scmp.lt.u32.totalorder %s104_s13, %s232_s0 }
   0x6   :  { %p110_p2 = pnand %p108_p1, %p105_p0 }
   0x8   :  { %113 = shalt.err (!%p110_p2)
}
   0x9   :  { %s114_s18 = scalar_lea.vmem %s16_s10, 256  ;;  %p119_p4 = scmp.lt.s32.totalorder %s16_s10, %s16_s10 }
   0xa   :  { %p115_p3 = scmp.ne.s32.totalorder %s16_s10, %s114_s18  ;;  %p120_p5 = scmp.lt.s32.totalorder %s114_s18, %s114_s18 }
   0xc   :  { %p121_p6 = por %p120_p5, %p119_p4 }
   0xe   :  { %p122_p7 = pnand %p121_p6, %p115_p3 }
  0x10   :  { %125 = shalt.err (!%p122_p7)
}
  0x11   :  { %s177_s19 = smov 128   ;;  %s178_s20 = smov 8  }
  0x12   :  { %21 = dma.hbm_to_vmem [thread:$0]  %s232_s0, 256, %s16_s10, [#allocation3], %s177_s19, %s177_s19, %s178_s20  }
  0x13   :  { %s179_s23 = smov [#allocation5]   ;;  %s126_s27 = scalar_lea.hbm %s233_s1, 256 }
  0x14   :  { %s27_s24 = sshll.u32 %s179_s23, 4  ;;  %p127_p8 = scmp.ne.s32.totalorder %s233_s1, %s126_s27  ;;  %s28_s24 = int_to_ptr.vmem [resolvable:$true] %s27_s24 }
  0x15   :  { %p130_p9 = scmp.lt.u32.totalorder %s126_s27, %s233_s1 }
  0x17   :  { %p132_p10 = pnand %p130_p9, %p127_p8 }
  0x19   :  { %135 = shalt.err (!%p132_p10)
}
  0x1a   :  { %s136_s4 = scalar_lea.vmem %s28_s24, 256  ;;  %p141_p12 = scmp.lt.s32.totalorder %s28_s24, %s28_s24 }
  0x1b   :  { %p137_p11 = scmp.ne.s32.totalorder %s28_s24, %s136_s4  ;;  %p142_p13 = scmp.lt.s32.totalorder %s136_s4, %s136_s4 }
  0x1d   :  { %p143_p0 = por %p142_p13, %p141_p12 }
  0x1f   :  { %p144_p1 = pnand %p143_p0, %p137_p11 }
  0x21   :  { %147 = shalt.err (!%p144_p1)
}
  0x22   :  { %33 = dma.hbm_to_vmem [thread:$0]  %s233_s1, 256, %s28_s24, [#allocation6], %s177_s19, %s177_s19, %s178_s20  }
  0x23   :  { %170 = dma.done.wait [#allocation3], 256  }
  0x24   :  { %171 = vsyncadd [#allocation3], 4294967040 }
  0x25   :  { %172 = dma.done.wait [#allocation6], 256  }
  0x26   :  { %173 = vsyncadd [#allocation6], 4294967040  ;;  %v45_v0 = vld [vmem:[#allocation5] sm:$0xff]  ;;  %v46_v1 = vld [vmem:[#allocation5 + $0x8] sm:$0xff]  ;;  %s180_s6 = smov [#allocation7]  }
  0x27   :  { %v47_v2 = vld [vmem:[#allocation2] sm:$0xff]  ;;  %v48_v3 = vld [vmem:[#allocation2 + $0x8] sm:$0xff]  ;;  %s88_s7 = sshll.u32 %s180_s6, 4  ;;  %s89_s7 = int_to_ptr.vmem [resolvable:$true] %s88_s7 }
  0x28   :  { %v49_v4 = vsub.f32 %v45_v0, %v47_v2  ;;  %v50_v5 = vsub.f32 %v46_v1, %v48_v3  ;;  %s148_s8 = scalar_lea.vmem %s89_s7, 128  ;;  %p153_p3 = scmp.lt.s32.totalorder %s89_s7, %s89_s7 }
  0x29   :  { %p149_p2 = scmp.ne.s32.totalorder %s89_s7, %s148_s8  ;;  %p154_p4 = scmp.lt.s32.totalorder %s148_s8, %s148_s8 }
  0x2a   :  { %v51_v6 = vand.u32 2147483647, %v49_v4  ;;  %v52_v7 = vand.u32 2147483647, %v50_v5 }
  0x2b   :  { %p155_p5 = por %p154_p4, %p153_p3 }
  0x2c   :  { %v60_v8 = vadd.f32 %v52_v7, %v51_v6 }
  0x2d   :  { %p156_p6 = pnand %p155_p5, %p149_p2 }
  0x2e   :  { %62 = vst [vmem:[#allocation7] sm:$0xff] %v60_v8 }
  0x2f   :  { %159 = shalt.err (!%p156_p6)
}
  0x30   :  { %s160_s10 = scalar_lea.hbm %s234_s2, 128 }
  0x31   :  { %p161_p7 = scmp.ne.s32.totalorder %s234_s2, %s160_s10  ;;  %p164_p8 = scmp.lt.u32.totalorder %s160_s10, %s234_s2 }
  0x33   :  { %p166_p9 = pnand %p164_p8, %p161_p7 }
  0x35   :  { %169 = shalt.err (!%p166_p9)
}
  0x36   :  { %91 = dma.vmem_to_hbm [thread:$0]  %s89_s7, 128, %s234_s2, [#allocation4]  }
  0x37   :  { %174 = dma.done.wait [#allocation4], 128  }
  0x38   :  { %175 = vsyncadd [#allocation4], 4294967168 }
  0x39   :  { %95 = vsyncpa [#allocation3], 1 }
  0x3a   :  { %96 = vsyncpa [#allocation6], 1 }
  0x3b   :  { %97 = vsyncpa [#allocation4], 1 }

</bundles_post_ra>
